<compile_context>
chip_gen: v5e
topology: v5e:2x2
jax: 0.10.0
libtpu: 0.0.40
codegen_flags: <defaults>
</compile_context>

<pallas_src>
import functools
import math

import jax
import jax.numpy as jnp
import numpy as np
from jax.experimental import pallas as pl
from jax.experimental.pallas import tpu as pltpu

_VMEM_LIMIT = 64 * 1024 * 1024


# ---------------------------------------------------------------------------
# Kernel 1: fused QKV projection (q pre-scaled by 1/sqrt(d_heads)).
# ---------------------------------------------------------------------------
def _qkv_proj_kernel(x_ref, w_in_ref, b_in_ref, q_ref, k_ref, v_ref, *, q_scale):
    D = x_ref.shape[-1]
    x = x_ref[0]                                                    # (ts, D)
    qkv = jnp.dot(x, w_in_ref[...], preferred_element_type=jnp.float32)
    qkv = qkv + b_in_ref[...]                                       # f32 (ts, 3D)
    q_ref[0] = (qkv[:, :D] * q_scale).astype(q_ref.dtype)
    k_ref[0] = qkv[:, D:2 * D].astype(k_ref.dtype)
    v_ref[0] = qkv[:, 2 * D:].astype(v_ref.dtype)


# ---------------------------------------------------------------------------
# Kernel 2: flash attention (online softmax) + fused out-projection epilogue.
# Grid: (batch, q_tile, head, kv_tile); head & kv_tile are reduction axes.
# ---------------------------------------------------------------------------
def _flash_attn_kernel(q_ref, k_ref, v_ref, w_out_ref, b_out_ref, o_ref,
                       m_scr, l_scr, acc_scr, o_scr,
                       *, causal_mask, approx_recip):
    qi = pl.program_id(1)
    h = pl.program_id(2)
    ki = pl.program_id(3)
    n_heads = pl.num_programs(2)
    n_kv = pl.num_programs(3)
    tq = q_ref.shape[2]
    tk = k_ref.shape[2]
    cdt = k_ref.dtype

    # Fresh out_proj accumulator for every (batch, q-tile) output block.
    @pl.when(jnp.logical_and(h == 0, ki == 0))
    def _zero_out():
        o_scr[...] = jnp.zeros(o_scr.shape, jnp.float32)

    # Fresh online-softmax state for every (batch, q-tile, head).
    @pl.when(ki == 0)
    def _init_head():
        m_scr[...] = jnp.full(m_scr.shape, -jnp.inf, jnp.float32)
        l_scr[...] = jnp.zeros(l_scr.shape, jnp.float32)
        acc_scr[...] = jnp.zeros(acc_scr.shape, jnp.float32)

    def _update():
        q = q_ref[0, 0]                                  # (tq, dh), pre-scaled
        k = k_ref[0, 0]                                  # (tk, dh)
        v = v_ref[0, 0]                                  # (tk, dh)
        # Q @ K^T without materializing a transpose: contract the dh axes.
        s = jax.lax.dot_general(q, k, (((1,), (1,)), ((), ())),
                                preferred_element_type=jnp.float32)  # (tq, tk)
        if causal_mask:
            row = qi * tq + jax.lax.broadcasted_iota(jnp.int32, (tq, tk), 0)
            col = ki * tk + jax.lax.broadcasted_iota(jnp.int32, (tq, tk), 1)
            s = jnp.where(col > row, -jnp.inf, s)
        # Online softmax (all f32).
        m_prev = m_scr[...]
        m_new = jnp.maximum(m_prev, jnp.max(s, axis=-1, keepdims=True))
        alpha = jnp.exp(m_prev - m_new)
        p = jnp.exp(s - m_new)                                       # (tq, tk)
        l_scr[...] = alpha * l_scr[...] + jnp.sum(p, axis=-1, keepdims=True)
        acc_scr[...] = alpha * acc_scr[...] + jnp.dot(
            p.astype(cdt), v, preferred_element_type=jnp.float32)    # (tq, dh)
        m_scr[...] = m_new

    if causal_mask:
        # Skip KV tiles lying entirely above the diagonal for this q tile.
        @pl.when(ki * tk <= qi * tq + (tq - 1))
        def _masked_update():
            _update()
    else:
        _update()

    # Per-head epilogue: fold this head's contribution through out_proj.
    @pl.when(ki == n_kv - 1)
    def _head_done():
        inv_l = pl.reciprocal(l_scr[...], approx=approx_recip)       # (tq, 1)
        head_out = acc_scr[...] * inv_l                              # (tq, dh) f32
        o_scr[...] += jnp.dot(head_out.astype(cdt), w_out_ref[0],
                              preferred_element_type=jnp.float32)    # (tq, D)

    # Final write once all heads of this q tile are folded in (lane-dense D).
    @pl.when(jnp.logical_and(h == n_heads - 1, ki == n_kv - 1))
    def _write():
        o_ref[0] = (o_scr[...] + b_out_ref[...]).astype(o_ref.dtype)


# ---------------------------------------------------------------------------
# Wrapper.
# ---------------------------------------------------------------------------
def self_attention(x, w_in, b_in, w_out, b_out, *, n_heads, causal_mask=False,
                   q_tile=128, kv_tile=128, compute_dtype=None):
    """SelfAttention forward.  w_in: (D, 3D), b_in: (3D,), w_out: (D, D),
    b_out: (D,)  (Linear weights pre-transposed to (in, out))."""
    B, S, D = x.shape
    assert D % n_heads == 0
    dh = D // n_heads
    out_dtype = x.dtype
    cdt = np.dtype(compute_dtype) if compute_dtype is not None else np.dtype(x.dtype)
    itemsize = cdt.itemsize

    tq = min(q_tile, S)
    tk = min(kv_tile, S)
    if S % tq or S % tk:
        raise ValueError("sequence length must be divisible by the tile sizes")
    assert (tq == S or tq % 8 == 0) and (tk == S or tk % 8 == 0)

    # Parameter prep (pure XLA, one-time).  MXU operands go to compute dtype,
    # biases stay f32 (added to the f32 accumulators).
    x_c = x.astype(cdt)
    w_in_c = w_in.astype(cdt)
    w_out_r = w_out.astype(cdt).reshape(n_heads, dh, D)     # per-head row slabs
    b_in2 = jnp.asarray(b_in, jnp.float32).reshape(1, 3 * D)
    b_out2 = jnp.asarray(b_out, jnp.float32).reshape(1, D)

    # ---- Kernel 1: QKV projection -----------------------------------------
    proj_kernel = functools.partial(_qkv_proj_kernel, q_scale=1.0 / math.sqrt(dh))
    q, k, v = pl.pallas_call(
        proj_kernel,
        out_shape=tuple(jax.ShapeDtypeStruct((B, S, D), cdt) for _ in range(3)),
        grid_spec=pltpu.PrefetchScalarGridSpec(
            num_scalar_prefetch=0,
            grid=(B, S // tq),
            in_specs=[
                pl.BlockSpec((1, tq, D), lambda b, s: (b, s, 0)),      # x
                pl.BlockSpec((D, 3 * D), lambda b, s: (0, 0)),         # w_in
                pl.BlockSpec((1, 3 * D), lambda b, s: (0, 0)),         # b_in
            ],
            out_specs=[
                pl.BlockSpec((1, tq, D), lambda b, s: (b, s, 0)),      # q (scaled)
                pl.BlockSpec((1, tq, D), lambda b, s: (b, s, 0)),      # k
                pl.BlockSpec((1, tq, D), lambda b, s: (b, s, 0)),      # v
            ],
        ),
        compiler_params=pltpu.CompilerParams(
            dimension_semantics=("parallel", "parallel"),
            vmem_limit_bytes=_VMEM_LIMIT),
        cost_estimate=pl.CostEstimate(
            flops=int(6 * B * S * D * D),
            transcendentals=0,
            bytes_accessed=int((4 * B * S * D + 3 * D * D) * itemsize)),
    )(x_c, w_in_c, b_in2)

    # Head-major layout for the attention kernel (layout plumbing in XLA, so
    # the kernel only ever sees clean 2-D per-head tiles via BlockSpecs).
    def to_heads(t):
        return t.reshape(B, S, n_heads, dh).transpose(0, 2, 1, 3)     # (B,H,S,dh)

    q, k, v = to_heads(q), to_heads(k), to_heads(v)

    # ---- Kernel 2: flash attention + fused out-projection -----------------
    attn_kernel = functools.partial(
        _flash_attn_kernel,
        causal_mask=causal_mask,
        approx_recip=(cdt != np.dtype(np.float32)))
    nq, nk = S // tq, S // tk
    out = pl.pallas_call(
        attn_kernel,
        out_shape=jax.ShapeDtypeStruct((B, S, D), out_dtype),
        grid_spec=pltpu.PrefetchScalarGridSpec(
            num_scalar_prefetch=0,
            grid=(B, nq, n_heads, nk),
            in_specs=[
                pl.BlockSpec((1, 1, tq, dh), lambda b, q, h, k: (b, h, q, 0)),  # Q
                pl.BlockSpec((1, 1, tk, dh), lambda b, q, h, k: (b, h, k, 0)),  # K
                pl.BlockSpec((1, 1, tk, dh), lambda b, q, h, k: (b, h, k, 0)),  # V
                pl.BlockSpec((1, dh, D), lambda b, q, h, k: (h, 0, 0)),         # w_out
                pl.BlockSpec((1, D), lambda b, q, h, k: (0, 0)),                # b_out
            ],
            out_specs=pl.BlockSpec((1, tq, D), lambda b, q, h, k: (b, q, 0)),
            scratch_shapes=[
                pltpu.VMEM((tq, 1), jnp.float32),    # running max
                pltpu.VMEM((tq, 1), jnp.float32),    # running denominator
                pltpu.VMEM((tq, dh), jnp.float32),   # per-head accumulator
                pltpu.VMEM((tq, D), jnp.float32),    # out_proj accumulator
            ],
        ),
        compiler_params=pltpu.CompilerParams(
            dimension_semantics=("parallel", "parallel", "arbitrary", "arbitrary"),
            vmem_limit_bytes=_VMEM_LIMIT),
        cost_estimate=pl.CostEstimate(
            flops=int(4 * B * S * S * D + 2 * B * S * D * D),
            transcendentals=int(B * n_heads * S * S),
            bytes_accessed=int((B * S * D * (1 + 2 * nk) + D * D) * itemsize
                               + B * S * D * np.dtype(out_dtype).itemsize)),
    )(q, k, v, w_out_r, b_out2)
    return out


# ---------------------------------------------------------------------------
# Pure-JAX reference (PyTorch forward transcription, with the reshape applied).
# ---------------------------------------------------------------------------
def _reference(x, w_in, b_in, w_out, b_out, n_heads, causal_mask):
    B, S, D = x.shape
    dh = D // n_heads
    qkv = x @ w_in + b_in
    q, k, v = jnp.split(qkv, 3, axis=-1)
    q = q.reshape(B, S, n_heads, dh).transpose(0, 2, 1, 3)
    k = k.reshape(B, S, n_heads, dh).transpose(0, 2, 1, 3)
    v = v.reshape(B, S, n_heads, dh).transpose(0, 2, 1, 3)
    w = q @ jnp.swapaxes(k, -1, -2)
    if causal_mask:
        mask = jnp.triu(jnp.ones((S, S), dtype=bool), k=1)
        w = jnp.where(mask, -jnp.inf, w)
    w = w / math.sqrt(dh)
    w = jax.nn.softmax(w, axis=-1)
    o = (w @ v).transpose(0, 2, 1, 3).reshape(B, S, D)
    return o @ w_out + b_out


if __name__ == "__main__":
    # Small but multi-tile shapes: 2 q-tiles x 2 kv-tiles x 4 heads, so the
    # online softmax, causal tile-skipping and head accumulation are exercised.
    B, S, D, H = 2, 128, 64, 4          # d_heads = 16

    key = jax.random.PRNGKey(0)
    k1, k2, k3, k4, k5 = jax.random.split(key, 5)
    bound = 1.0 / math.sqrt(D)          # nn.Linear-style U(-1/sqrt(fan_in), ...)
    w_in = jax.random.uniform(k1, (D, 3 * D), jnp.float32, -bound, bound)
    b_in = jax.random.uniform(k2, (3 * D,), jnp.float32, -bound, bound)
    w_out = jax.random.uniform(k3, (D, D), jnp.float32, -bound, bound)
    b_out = jax.random.uniform(k4, (D,), jnp.float32, -bound, bound)
    x = jax.random.normal(k5, (B, S, D), jnp.float32)

    ok = True
    # f32 operands (tight check).
    for causal in (False, True):
        out = self_attention(x, w_in, b_in, w_out, b_out, n_heads=H,
                             causal_mask=causal, q_tile=64, kv_tile=64)
        out = jax.block_until_ready(out)
        ref = _reference(x, w_in, b_in, w_out, b_out, H, causal)
        ok &= bool(jnp.allclose(out, ref, atol=1e-3, rtol=1e-3))

    # bf16 MXU operands, f32 accumulation / softmax (looser check).
    out_bf16 = self_attention(x, w_in, b_in, w_out, b_out, n_heads=H,
                              causal_mask=True, q_tile=64, kv_tile=64,
                              compute_dtype=jnp.bfloat16)
    out_bf16 = jax.block_until_ready(out_bf16)
    ref_c = _reference(x, w_in, b_in, w_out, b_out, H, True)
    ok &= bool(jnp.allclose(out_bf16, ref_c, atol=7e-2, rtol=7e-2))

    if ok:
        print("KERNEL_OK")
    else:
        raise SystemExit("mismatch vs reference")
</pallas_src>

<mosaic_0001>
module attributes {stable_mosaic.version = 11 : i64} {
  func.func @_qkv_proj_kernel(%arg0: i32, %arg1: i32, %arg2: memref<1x64x64xf32, #tpu.memory_space<vmem>>, %arg3: memref<64x192xf32, #tpu.memory_space<vmem>>, %arg4: memref<1x192xf32, #tpu.memory_space<vmem>>, %arg5: memref<1x64x64xf32, #tpu.memory_space<vmem>>, %arg6: memref<1x64x64xf32, #tpu.memory_space<vmem>>, %arg7: memref<1x64x64xf32, #tpu.memory_space<vmem>>) attributes {dimension_semantics = [#tpu.dimension_semantics<parallel>, #tpu.dimension_semantics<parallel>], iteration_bounds = array<i64: 2, 2>, scalar_prefetch = 0 : i64, scratch_operands = 0 : i64, tpu.core_type = #tpu.core_type<tc>, window_params = [{transform_indices = @transform_0, window_bounds = array<i64: 1, 64, 64>}, {pipeline_mode = #tpu.pipeline_mode<synchronous>, transform_indices = @transform_1, window_bounds = array<i64: 64, 192>}, {pipeline_mode = #tpu.pipeline_mode<synchronous>, transform_indices = @transform_2, window_bounds = array<i64: 1, 192>}, {transform_indices = @transform_3, window_bounds = array<i64: 1, 64, 64>}, {transform_indices = @transform_4, window_bounds = array<i64: 1, 64, 64>}, {transform_indices = @transform_5, window_bounds = array<i64: 1, 64, 64>}]} {
    %c0 = arith.constant 0 : index
    %c0_0 = arith.constant 0 : index
    %c0_1 = arith.constant 0 : index
    %0 = vector.load %arg2[%c0, %c0_0, %c0_1] : memref<1x64x64xf32, #tpu.memory_space<vmem>>, vector<1x64x64xf32>
    %1 = vector.shape_cast %0 : vector<1x64x64xf32> to vector<64x64xf32>
    %c0_2 = arith.constant 0 : index
    %c0_3 = arith.constant 0 : index
    %2 = vector.load %arg3[%c0_2, %c0_3] : memref<64x192xf32, #tpu.memory_space<vmem>>, vector<64x192xf32>
    %cst = arith.constant dense<0.000000e+00> : vector<64x192xf32>
    %3 = tpu.matmul %1, %2, %cst {dimension_numbers = #tpu.dot_dimension_numbers<[1], [0], [0], [1], [0, 0, 1, 1], [], []>} : vector<64x64xf32>, vector<64x192xf32>, vector<64x192xf32> -> vector<64x192xf32>
    %c0_4 = arith.constant 0 : index
    %c0_5 = arith.constant 0 : index
    %4 = vector.load %arg4[%c0_4, %c0_5] : memref<1x192xf32, #tpu.memory_space<vmem>>, vector<1x192xf32>
    %5 = vector.broadcast %4 : vector<1x192xf32> to vector<64x192xf32>
    %6 = arith.addf %3, %5 : vector<64x192xf32>
    %7 = vector.extract_strided_slice %6 {offsets = [0, 0], sizes = [64, 64], strides = [1, 1]} : vector<64x192xf32> to vector<64x64xf32>
    %cst_6 = arith.constant 2.500000e-01 : f32
    %8 = vector.broadcast %cst_6 : f32 to vector<64x64xf32>
    %9 = arith.mulf %7, %8 : vector<64x64xf32>
    %c0_7 = arith.constant 0 : index
    %c0_8 = arith.constant 0 : index
    %c0_9 = arith.constant 0 : index
    %10 = vector.load %arg5[%c0_7, %c0_8, %c0_9] : memref<1x64x64xf32, #tpu.memory_space<vmem>>, vector<1x64x64xf32>
    %11 = vector.shape_cast %10 : vector<1x64x64xf32> to vector<64x64xf32>
    %12 = vector.shape_cast %9 : vector<64x64xf32> to vector<1x64x64xf32>
    tpu.vector_store %arg5[%c0_7, %c0_8, %c0_9], %12 {strides = array<i32>} : memref<1x64x64xf32, #tpu.memory_space<vmem>>, vector<1x64x64xf32>,
    %13 = vector.extract_strided_slice %6 {offsets = [0, 64], sizes = [64, 64], strides = [1, 1]} : vector<64x192xf32> to vector<64x64xf32>
    %c0_10 = arith.constant 0 : index
    %c0_11 = arith.constant 0 : index
    %c0_12 = arith.constant 0 : index
    %14 = vector.load %arg6[%c0_10, %c0_11, %c0_12] : memref<1x64x64xf32, #tpu.memory_space<vmem>>, vector<1x64x64xf32>
    %15 = vector.shape_cast %14 : vector<1x64x64xf32> to vector<64x64xf32>
    %16 = vector.shape_cast %13 : vector<64x64xf32> to vector<1x64x64xf32>
    tpu.vector_store %arg6[%c0_10, %c0_11, %c0_12], %16 {strides = array<i32>} : memref<1x64x64xf32, #tpu.memory_space<vmem>>, vector<1x64x64xf32>,
    %17 = vector.extract_strided_slice %6 {offsets = [0, 128], sizes = [64, 64], strides = [1, 1]} : vector<64x192xf32> to vector<64x64xf32>
    %c0_13 = arith.constant 0 : index
    %c0_14 = arith.constant 0 : index
    %c0_15 = arith.constant 0 : index
    %18 = vector.load %arg7[%c0_13, %c0_14, %c0_15] : memref<1x64x64xf32, #tpu.memory_space<vmem>>, vector<1x64x64xf32>
    %19 = vector.shape_cast %18 : vector<1x64x64xf32> to vector<64x64xf32>
    %20 = vector.shape_cast %17 : vector<64x64xf32> to vector<1x64x64xf32>
    tpu.vector_store %arg7[%c0_13, %c0_14, %c0_15], %20 {strides = array<i32>} : memref<1x64x64xf32, #tpu.memory_space<vmem>>, vector<1x64x64xf32>,
    return
  }
  func.func @transform_0(%arg0: i32, %arg1: i32) -> (i32, i32, i32) {
    %c0_i32 = arith.constant 0 : i32
    %c0_i32_0 = arith.constant 0 : i32
    return %arg0, %arg1, %c0_i32 : i32, i32, i32
  }
  func.func @transform_1(%arg0: i32, %arg1: i32) -> (i32, i32) {
    %c0_i32 = arith.constant 0 : i32
    %c0_i32_0 = arith.constant 0 : i32
    %c0_i32_1 = arith.constant 0 : i32
    return %c0_i32, %c0_i32_0 : i32, i32
  }
  func.func @transform_2(%arg0: i32, %arg1: i32) -> (i32, i32) {
    %c0_i32 = arith.constant 0 : i32
    %c0_i32_0 = arith.constant 0 : i32
    %c0_i32_1 = arith.constant 0 : i32
    return %c0_i32, %c0_i32_0 : i32, i32
  }
  func.func @transform_3(%arg0: i32, %arg1: i32) -> (i32, i32, i32) {
    %c0_i32 = arith.constant 0 : i32
    %c0_i32_0 = arith.constant 0 : i32
    return %arg0, %arg1, %c0_i32 : i32, i32, i32
  }
  func.func @transform_4(%arg0: i32, %arg1: i32) -> (i32, i32, i32) {
    %c0_i32 = arith.constant 0 : i32
    %c0_i32_0 = arith.constant 0 : i32
    return %arg0, %arg1, %c0_i32 : i32, i32, i32
  }
  func.func @transform_5(%arg0: i32, %arg1: i32) -> (i32, i32, i32) {
    %c0_i32 = arith.constant 0 : i32
    %c0_i32_0 = arith.constant 0 : i32
    return %arg0, %arg1, %c0_i32 : i32, i32, i32
  }
}

</mosaic_0001>

<bundles_post_ra>
// kernel: tpu_custom_call.1
= control target key start
LH: loop header
LB: loop body
LE: loop exit
PB: predicated region body
PF: predicated region fallthrough
CT: control target
= control target key end

     0   :  { %s865_s18 = smov 0   ;;  %s867_s19 = smov 0   ;;  %s1047_s0 = inlined_call_operand.vmem [shape: f32[2,128,64], index: 0, kind: input, shape index: {}]   ;;  %s1048_s1 = inlined_call_operand.vmem [shape: f32[64,192], index: 1, kind: input, shape index: {}]   ;;  %s1049_s2 = inlined_call_operand.vmem [shape: f32[1,192], index: 2, kind: input, shape index: {}]   ;;  %s1050_s3 = inlined_call_operand.vmem [shape: f32[2,128,64], index: 3, kind: output, shape index: {0}]   ;;  %s1051_s4 = inlined_call_operand.vmem [shape: f32[2,128,64], index: 4, kind: output, shape index: {1}]   ;;  %s1052_s5 = inlined_call_operand.vmem [shape: f32[2,128,64], index: 5, kind: output, shape index: {2}]  }
   0x1   :  { %s869_s20 = smov 0   ;;  %s871_s21 = smov 0  }
   0x2   :  { %s873_s22 = smov 0  }
   0x3 LB: > { %s25_s23 = sadd.s32 1, %s824_s20  ;;  %s28_s24 = sadd.s32 1, %s828_s21  ;;  %s832_s22 = sphi %s873_s22, %s16_s22   ;;  %s828_s21 = sphi %s871_s21, %s1056_s21   ;;  %s824_s20 = sphi %s869_s20, %s1055_s20   ;;  %s820_s19 = sphi %s867_s19, %s1054_s19   ;;  %s816_s18 = sphi %s865_s18, %s1053_s18  }
   0x4   : > { %p26_p0 = scmp.ge.s32.totalorder %s25_s23, 2  ;;  %p706_p1 = scmp.ge.s32.totalorder %s832_s22, 1 }
   0x5   : > { %p217_p2 = scmp.lt.s32.totalorder %s832_s22, 5 }
   0x6   : > { %s1058_s23 = smov (%p26_p0, %s25_s23), 0  ;;  %s1060_s24 = smov (!%p26_p0, %s28_s24), %s828_s21 }
   0x7   : > { %p218_p3 = pnand %p706_p1, %p217_p2  ;;  %p30_p4 = scmp.ge.s32.totalorder %s1060_s24, 2 }
   0x8   : > { %s707_s29 = sshll.u32 (!%p218_p3), %s816_s18, 3  ;;  %p272_p5 = scmp.lt.s32.totalorder (!%p218_p3), %s820_s19, 1 }
   0x9   : > { %s1062_s24 = smov (%p30_p4, %s1060_s24), 0  ;;  %221 = sbr.rel (%p218_p3) target bundleno = 306 (0x132), region = 32 }
   0xa   : > { %p274_p6 = scmp.lt.s32.totalorder (!%p218_p3), %s707_s29, 15  ;;  %s834_s30 = smov (!%p218_p3), 64  }
   0xe   : > { %v333_v0 = vld [vmem:[%s1048_s1 + $0x70] sm:$0xff]  ;;  %v331_v1 = vld [vmem:[%s1048_s1 + $0x60] sm:$0xff]  ;;  %s1064_s19 = smov (!%p272_p5, %s820_s19), 1  ;;  %s1066_s29 = smov (!%p274_p6, %s707_s29), 15  ;;  %v334_v7 = vld [vmem:[%s1048_s1 + $0x78] sm:$0xff]  ;;  %vm341_vm0 = vcmask 523264  }
   0xf   : > { %374 = vmatpush.msra.mxu0 %v333_v0  ;;  %737 = vmatpush.msra.mxu2 %v333_v0  ;;  %v329_v2 = vld [vmem:[%s1048_s1 + $0x50] sm:$0xff]  ;;  %v327_v3 = vld [vmem:[%s1048_s1 + $0x40] sm:$0xff]  ;;  %s708_s9 = sshll.u32 %s1064_s19, 4  ;;  %v332_v8 = vld [vmem:[%s1048_s1 + $0x68] sm:$0xff] }
  0x10   : > { %s277_s10 = sadd.s32 %s708_s9, %s1066_s29  ;;  %v325_v4 = vld [vmem:[%s1048_s1 + $0x30] sm:$0xff]  ;;  %v323_v5 = vld [vmem:[%s1048_s1 + $0x20] sm:$0xff]  ;;  %745 = vmatpush.msra.mxu3 %v334_v7  ;;  %415 = vmatpush.msra.mxu1 %v334_v7  ;;  %v330_v12 = vld [vmem:[%s1048_s1 + $0x58] sm:$0xff] }
  0x11   : > { %375 = vmatpush.msra.mxu0 %v331_v1  ;;  %738 = vmatpush.msra.mxu2 %v331_v1  ;;  %s910_s13 = sshll.u32 %s277_s10, 3  ;;  %v321_v6 = vld [vmem:[%s1048_s1 + $0x10] sm:$0xff]  ;;  %v319_v9 = vld [vmem:[%s1048_s1] sm:$0xff]  ;;  %v328_v13 = vld [vmem:[%s1048_s1 + $0x48] sm:$0xff] }
  0x12   : > { %s922_s25 = scalar_lea.vmem %s1047_s0, %s910_s13  ;;  %746 = vmatpush.msra.mxu3 %v332_v8  ;;  %416 = vmatpush.msra.mxu1 %v332_v8  ;;  %v326_v14 = vld [vmem:[%s1048_s1 + $0x38] sm:$0xff]  ;;  %v324_v15 = vld [vmem:[%s1048_s1 + $0x28] sm:$0xff]  ;;  %v335_v24 = vld [vmem:[%s1049_s2] sm:$0x3]  ;;  %s982_s29 = scalar_lea.vmem %s1050_s3, %s910_s13 }
  0x13   : > { %376 = vmatpush.msra.mxu0 %v329_v2  ;;  %739 = vmatpush.msra.mxu2 %v329_v2  ;;  %v311_v10 = vld [vmem:[%s922_s25] sm:$0xff]  ;;  %v312_v16 = vld [vmem:[%s922_s25 + $0x8] sm:$0xff]  ;;  %v322_v18 = vld [vmem:[%s1048_s1 + $0x18] sm:$0xff]  ;;  %v337_v25 = vperm.slane %v335_v24, 0  ;;  %v338_v50 = vperm.slane %v335_v24, 1  ;;  %s309_s8 = scalar_lea.vmem %s1052_s5, %s910_s13  ;;  %s299_s11 = scalar_lea.vmem %s1051_s4, %s910_s13 }
  0x14   : > { %v315_v11 = vld [vmem:[%s922_s25 + $0x20] sm:$0xff]  ;;  %747 = vmatpush.msra.mxu3 %v330_v12  ;;  %417 = vmatpush.msra.mxu1 %v330_v12  ;;  %v316_v17 = vld [vmem:[%s922_s25 + $0x28] sm:$0xff]  ;;  %v313_v20 = vld [vmem:[%s922_s25 + $0x10] sm:$0xff] }
  0x15   : > { %377 = vmatpush.msra.mxu0 %v327_v3  ;;  %740 = vmatpush.msra.mxu2 %v327_v3  ;;  %v320_v19 = vld [vmem:[%s1048_s1 + $0x8] sm:$0xff]  ;;  %v317_v21 = vld [vmem:[%s922_s25 + $0x30] sm:$0xff]  ;;  %v314_v22 = vld [vmem:[%s922_s25 + $0x18] sm:$0xff] }
  0x16   : > { %748 = vmatpush.msra.mxu3 %v328_v13  ;;  %418 = vmatpush.msra.mxu1 %v328_v13  ;;  %v318_v23 = vld [vmem:[%s922_s25 + $0x38] sm:$0xff] }
  0x17   : > { %378 = vmatpush.msra.mxu0 %v325_v4  ;;  %741 = vmatpush.msra.mxu2 %v325_v4 }
  0x18   : > { %749 = vmatpush.msra.mxu3 %v326_v14  ;;  %419 = vmatpush.msra.mxu1 %v326_v14 }
  0x19   : > { %379 = vmatpush.msra.mxu0 %v323_v5  ;;  %742 = vmatpush.msra.mxu2 %v323_v5 }
  0x1a   : > { %750 = vmatpush.msra.mxu3 %v324_v15  ;;  %420 = vmatpush.msra.mxu1 %v324_v15 }
  0x1b   : > { %380 = vmatpush.msra.mxu0 %v321_v6  ;;  %743 = vmatpush.msra.mxu2 %v321_v6 }
  0x1c   : > { %751 = vmatpush.msra.mxu3 %v322_v18  ;;  %421 = vmatpush.msra.mxu1 %v322_v18 }
  0x1d   : > { %381 = vmatpush.msra.mxu0 %v319_v9  ;;  %744 = vmatpush.msra.mxu2 %v319_v9 }
  0x1e   : > { %719 = vmatmul.msk.f32.vlgmr.msra.gmra.mxu0 %vm341_vm0, %v311_v10  ;;  %723 = vmatmul.msk.f32.vlgmr.msra.gmra.mxu2 %vm341_vm0, %v315_v11 }
  0x1f   : > { %752 = vmatpush.msra.mxu3 %v320_v19  ;;  %422 = vmatpush.msra.mxu1 %v320_v19 }
  0x20   : > { %731 = vmatmul.msk.f32.vlgmr.msra.gmra.mxu3 %vm341_vm0, %v315_v11  ;;  %727 = vmatmul.msk.f32.vlgmr.msra.gmra.mxu1 %vm341_vm0, %v311_v10 }
  0x26   : > { %720 = vmatmul.msk.f32.gmra.mxu0 %vm341_vm0, %v312_v16  ;;  %724 = vmatmul.msk.f32.gmra.mxu2 %vm341_vm0, %v316_v17 }
  0x28   : > { %732 = vmatmul.msk.f32.gmra.mxu3 %vm341_vm0, %v316_v17  ;;  %728 = vmatmul.msk.f32.gmra.mxu1 %vm341_vm0, %v312_v16 }
  0x2e   : > { %721 = vmatmul.msk.f32.gmra.mxu0 %vm341_vm0, %v313_v20  ;;  %725 = vmatmul.msk.f32.gmra.mxu2 %vm341_vm0, %v317_v21 }
  0x30   : > { %733 = vmatmul.msk.f32.gmra.mxu3 %vm341_vm0, %v317_v21  ;;  %729 = vmatmul.msk.f32.gmra.mxu1 %vm341_vm0, %v313_v20 }
  0x36   : > { %722 = vmatmul.msk.f32.gmra.mxu0 %vm341_vm0, %v314_v22  ;;  %726 = vmatmul.msk.f32.gmra.mxu2 %vm341_vm0, %v318_v23 }
  0x38   : > { %734 = vmatmul.msk.f32.gmra.mxu3 %vm341_vm0, %v318_v23  ;;  %730 = vmatmul.msk.f32.gmra.mxu1 %vm341_vm0, %v314_v22 }
  0x9b   : > { %v383_v26 = vpop.f32.mrf.mxu0 }
  0x9c   : > { %v384_v27 = vadd.f32 %v383_v26, %v337_v25 }
  0x9d   : > { %v424_v51 = vpop.f32.mrf.mxu1 }
  0x9e   : > { %v448_v28 = vmul.f32 0.25, %v384_v27  ;;  %472 = vrot.lane.b32.xlu0 %v384_v27, %s834_s30  ;;  %v425_v53 = vadd.f32 %v424_v51, %v338_v50 }
  0xa0   : > { %456 = vst.msk [vmem:[%s982_s29] sm:$0xff] %vm341_vm0, %v448_v28 }
  0xa1   : > { %v395_v29 = vpop.f32.mrf.mxu2  ;;  %504 = vst.msk [vmem:[%s309_s8] sm:$0xff] %vm341_vm0, %v425_v53 }
  0xa2   : > { %v396_v30 = vadd.f32 %v395_v29, %v337_v25 }
  0xa3   : > { %v386_v31 = vpop.f32.mrf.mxu0  ;;  %v436_v52 = vpop.f32.mrf.mxu3 }
  0xa4   : > { %v387_v32 = vadd.f32 %v386_v31, %v337_v25  ;;  %v452_v33 = vmul.f32 0.25, %v396_v30  ;;  %480 = vrot.lane.b32.xlu2 %v396_v30, %s834_s30  ;;  %v437_v54 = vadd.f32 %v436_v52, %v338_v50 }
  0xa5   : > { %v427_v55 = vpop.f32.mrf.mxu1 }
  0xa6   : > { %v449_v34 = vmul.f32 0.25, %v387_v32  ;;  %460 = vst.msk [vmem:[%s982_s29 + $0x20] sm:$0xff] %vm341_vm0, %v452_v33  ;;  %474 = vrot.lane.b32.xlu0 %v387_v32, %s834_s30  ;;  %v428_v57 = vadd.f32 %v427_v55, %v338_v50 }
  0xa7   : > { %508 = vst.msk [vmem:[%s309_s8 + $0x20] sm:$0xff] %vm341_vm0, %v437_v54 }
  0xa8   : > { %457 = vst.msk [vmem:[%s982_s29 + $0x8] sm:$0xff] %vm341_vm0, %v449_v34 }
  0xa9   : > { %v398_v35 = vpop.f32.mrf.mxu2  ;;  %505 = vst.msk [vmem:[%s309_s8 + $0x8] sm:$0xff] %vm341_vm0, %v428_v57 }
  0xaa   : > { %v399_v36 = vadd.f32 %v398_v35, %v337_v25 }
  0xab   : > { %v389_v37 = vpop.f32.mrf.mxu0  ;;  %v439_v56 = vpop.f32.mrf.mxu3 }
  0xac   : > { %v390_v38 = vadd.f32 %v389_v37, %v337_v25  ;;  %v453_v39 = vmul.f32 0.25, %v399_v36  ;;  %482 = vrot.lane.b32.xlu2 %v399_v36, %s834_s30  ;;  %v440_v58 = vadd.f32 %v439_v56, %v338_v50 }
  0xad   : > { %v430_v60 = vpop.f32.mrf.mxu1 }
  0xae   : > { %v450_v40 = vmul.f32 0.25, %v390_v38  ;;  %461 = vst.msk [vmem:[%s982_s29 + $0x28] sm:$0xff] %vm341_vm0, %v453_v39  ;;  %476 = vrot.lane.b32.xlu1 %v390_v38, %s834_s30  ;;  %v431_v62 = vadd.f32 %v430_v60, %v338_v50 }
  0xaf   : > { %509 = vst.msk [vmem:[%s309_s8 + $0x28] sm:$0xff] %vm341_vm0, %v440_v58 }
  0xb0   : > { %458 = vst.msk [vmem:[%s982_s29 + $0x10] sm:$0xff] %vm341_vm0, %v450_v40 }
  0xb1   : > { %v401_v41 = vpop.f32.mrf.mxu2  ;;  %506 = vst.msk [vmem:[%s309_s8 + $0x10] sm:$0xff] %vm341_vm0, %v431_v62 }
  0xb2   : > { %v402_v42 = vadd.f32 %v401_v41, %v337_v25 }
  0xb3   : > { %v392_v43 = vpop.f32.mrf.mxu0  ;;  %v442_v61 = vpop.f32.mrf.mxu3 }
  0xb4   : > { %v393_v44 = vadd.f32 %v392_v43, %v337_v25  ;;  %v454_v45 = vmul.f32 0.25, %v402_v42  ;;  %484 = vrot.lane.b32.xlu0 %v402_v42, %s834_s30  ;;  %v443_v63 = vadd.f32 %v442_v61, %v338_v50 }
  0xb5   : > { %v433_v1 = vpop.f32.mrf.mxu1 }
  0xb6   : > { %v451_v46 = vmul.f32 0.25, %v393_v44  ;;  %462 = vst.msk [vmem:[%s982_s29 + $0x30] sm:$0xff] %vm341_vm0, %v454_v45  ;;  %478 = vrot.lane.b32.xlu1 %v393_v44, %s834_s30  ;;  %v434_v3 = vadd.f32 %v433_v1, %v338_v50 }
  0xb7   : > { %510 = vst.msk [vmem:[%s309_s8 + $0x30] sm:$0xff] %vm341_vm0, %v443_v63 }
  0xb8   : > { %459 = vst.msk [vmem:[%s982_s29 + $0x18] sm:$0xff] %vm341_vm0, %v451_v46 }
  0xb9   : > { %v404_v47 = vpop.f32.mrf.mxu2  ;;  %507 = vst.msk [vmem:[%s309_s8 + $0x18] sm:$0xff] %vm341_vm0, %v434_v3 }
  0xba   : > { %v405_v48 = vadd.f32 %v404_v47, %v337_v25 }
  0xbb   : > { %v445_v2 = vpop.f32.mrf.mxu3 }
  0xbc   : > { %v455_v49 = vmul.f32 0.25, %v405_v48  ;;  %v446_v4 = vadd.f32 %v445_v2, %v338_v50 }
  0xbe   : > { %463 = vst.msk [vmem:[%s982_s29 + $0x38] sm:$0xff] %vm341_vm0, %v455_v49  ;;  %486 = vrot.lane.b32.xlu1 %v405_v48, %s834_s30 }
  0xbf   : > { %511 = vst.msk [vmem:[%s309_s8 + $0x38] sm:$0xff] %vm341_vm0, %v446_v4 }
  0xfe   : > { %v481_v59 = vpop.permute.xlu2 %480 }
  0xff   : > { %500 = vst.msk [vmem:[%s299_s11 + $0x20] sm:$0xff] %vm341_vm0, %v481_v59 }
 0x106   : > { %v483_v0 = vpop.permute.xlu2 %482 }
 0x107   : > { %501 = vst.msk [vmem:[%s299_s11 + $0x28] sm:$0xff] %vm341_vm0, %v483_v0 }
 0x110   : > { %v473_v5 = vpop.permute.xlu0 %472 }
 0x111   : > { %496 = vst.msk [vmem:[%s299_s11] sm:$0xff] %vm341_vm0, %v473_v5 }
 0x118   : > { %v475_v6 = vpop.permute.xlu0 %474 }
 0x119   : > { %497 = vst.msk [vmem:[%s299_s11 + $0x8] sm:$0xff] %vm341_vm0, %v475_v6 }
 0x120   : > { %v477_v7 = vpop.permute.xlu1 %476 }
 0x121   : > { %498 = vst.msk [vmem:[%s299_s11 + $0x10] sm:$0xff] %vm341_vm0, %v477_v7 }
 0x126   : > { %v485_v8 = vpop.permute.xlu0 %484 }
 0x127   : > { %502 = vst.msk [vmem:[%s299_s11 + $0x30] sm:$0xff] %vm341_vm0, %v485_v8 }
 0x128   : > { %v479_v9 = vpop.permute.xlu1 %478 }
 0x129   : > { %499 = vst.msk [vmem:[%s299_s11 + $0x18] sm:$0xff] %vm341_vm0, %v479_v9 }
 0x130   : > { %v487_v10 = vpop.permute.xlu1 %486 }
 0x131   : > { %503 = vst.msk [vmem:[%s299_s11 + $0x38] sm:$0xff] %vm341_vm0, %v487_v10 }
 0x132 PF: > { %s16_s22 = sadd.s32 1, %s832_s22   ;;  %s1053_s18 = smov %s824_s20 }
 0x133   : > { %p13_p7 = scmp.ge.s32.totalorder %s16_s22, 6   ;;  %s1054_s19 = smov %s828_s21 }
 0x134   : > { %s1055_s20 = smov %s1058_s23  ;;  %s1056_s21 = smov %s1062_s24 }
 0x135   :  { %15 = sbr.rel (!%p13_p7) target bundleno = 3 (0x3), region = 86 }

</bundles_post_ra>
